<compile_context>
chip_gen: v7x
topology: tpu7x:2x2x1
jax: 0.10.0
libtpu: 0.0.40
codegen_flags: <defaults>
</compile_context>

<pallas_src>
import functools

import jax
import jax.numpy as jnp
from jax import lax
from jax.experimental import pallas as pl
from jax.experimental.pallas import tpu as pltpu

LN_EPS = 1e-5


def _round_up(a, b):
    return (a + b - 1) // b * b


def _layernorm(y, gamma, beta):
    """Two-pass (centered) LayerNorm in f32 — numerically robust."""
    mu = jnp.mean(y, axis=-1, keepdims=True)
    yc = y - mu
    var = jnp.mean(yc * yc, axis=-1, keepdims=True)
    return yc * lax.rsqrt(var + LN_EPS) * gamma + beta


def _gelu(y, approximate):
    if approximate:
        # tanh-approx GELU: the transcendental runs on the EUP (its own VLIW
        # slot), freeing the VALU that the erf polynomial was saturating.
        c = jnp.float32(0.7978845608028654)          # sqrt(2/pi)
        return 0.5 * y * (1.0 + jnp.tanh(c * (y + jnp.float32(0.044715) * y * y * y)))
    # Exact erf GELU (PyTorch F.gelu default).
    return 0.5 * y * (1.0 + lax.erf(y * jnp.float32(0.7071067811865475)))


def mlp_readout_kernel(x_ref, w1_ref, g1_ref, b1_ref, w2_ref, g2_ref, b2_ref,
                       w3_ref, o_ref, *, n_rows, block_rows, approx_gelu):
    # Ragged tail: zero the padded rows of the last block so they are
    # well-defined (their output rows are dropped by the clamped store).
    tail = n_rows % block_rows          # static Python int
    if tail:
        @pl.when(pl.program_id(0) == pl.num_programs(0) - 1)
        def _zero_tail():
            rows = lax.broadcasted_iota(
                jnp.int32, (block_rows, x_ref.shape[-1]), 0)
            x_ref[...] = jnp.where(rows < tail, x_ref[...],
                                   jnp.zeros_like(x_ref)).astype(x_ref.dtype)

    gamma1 = g1_ref[...].astype(jnp.float32)
    beta1 = b1_ref[...].astype(jnp.float32)
    gamma2 = g2_ref[...].astype(jnp.float32)
    beta2 = b2_ref[...].astype(jnp.float32)

    # --- layer 0: Linear (no bias) -> LayerNorm -> GELU -> Dropout(eval) ---
    y = jnp.dot(x_ref[...], w1_ref[...], preferred_element_type=jnp.float32)
    y = _gelu(_layernorm(y, gamma1, beta1), approx_gelu)

    # --- layer 1: Linear (no bias) -> LayerNorm -> GELU -> Dropout(eval) ---
    y = jnp.dot(y.astype(w2_ref.dtype), w2_ref[...],
                preferred_element_type=jnp.float32)
    y = _gelu(_layernorm(y, gamma2, beta2), approx_gelu)

    # --- final Linear (no bias) ---
    o_ref[...] = jnp.dot(y.astype(w3_ref.dtype), w3_ref[...],
                         preferred_element_type=jnp.float32).astype(o_ref.dtype)


def _pick_row_tile(n_rows, tile_n, sublane):
    if n_rows <= tile_n:
        return _round_up(n_rows, sublane)
    # Large N: 256-aligned (MXU row cadence on v6e/v7x; also /128 for v5e),
    # and capped so the grid has >= 2 steps for v7x's two TensorCores.
    tn = min(tile_n, _round_up(pl.cdiv(n_rows, 2), 256))
    return _round_up(tn, sublane)


@functools.partial(jax.jit,
                   static_argnames=("tile_n", "approx_gelu", "compute_dtype"))
def mlp_readout(x, w1t, g1, b1, w2t, g2, b2, w3t, *, tile_n=1024,
                approx_gelu=True, compute_dtype=jnp.bfloat16):
    """x: [N, D_in]; wKt: [in_k, out_k] (transposed PyTorch weights).

    compute_dtype: dtype for x / weights / output (matmul accumulation and
    LN/GELU math stay f32 in-kernel). bf16 halves HBM traffic and is the
    native MXU dtype; use jnp.float32 for exact PyTorch parity.
    """
    N, D_in = x.shape
    D1 = w1t.shape[1]
    D2 = w2t.shape[1]
    D_out = w3t.shape[1]

    xc = x.astype(compute_dtype)
    w1c = w1t.astype(compute_dtype)
    w2c = w2t.astype(compute_dtype)
    w3c = w3t.astype(compute_dtype)

    # Sublane packing: 8 rows per vreg group for f32, 16 for bf16.
    sublane = 8 * max(1, 4 // jnp.dtype(compute_dtype).itemsize)
    tn = _pick_row_tile(N, tile_n, sublane)
    grid = (pl.cdiv(N, tn),)   # no wrapper-side padding copy of x

    # Grid-invariant blocks (weights / LN params): fetched once, never revisited.
    full = lambda shape: pl.BlockSpec(shape, lambda i: (0, 0))

    kernel = functools.partial(mlp_readout_kernel, n_rows=N, block_rows=tn,
                               approx_gelu=approx_gelu)

    out = pl.pallas_call(
        kernel,
        out_shape=jax.ShapeDtypeStruct((N, D_out), compute_dtype),
        grid_spec=pltpu.PrefetchScalarGridSpec(
            num_scalar_prefetch=0,
            grid=grid,
            in_specs=[
                pl.BlockSpec((tn, D_in), lambda i: (i, 0)),   # x row tile
                full((D_in, D1)),                             # W1^T
                full((1, D1)),                                # gamma1
                full((1, D1)),                                # beta1
                full((D1, D2)),                               # W2^T
                full((1, D2)),                                # gamma2
                full((1, D2)),                                # beta2
                full((D2, D_out)),                            # W3^T
            ],
            out_specs=pl.BlockSpec((tn, D_out), lambda i: (i, 0)),
        ),
        compiler_params=pltpu.CompilerParams(
            dimension_semantics=("parallel",)),
    )(xc, w1c, g1, b1, w2c, g2, b2, w3c)

    return out


def _reference(x, w1t, g1, b1, w2t, g2, b2, w3t, *, approx_gelu=False):
    """Pure-JAX reference mirroring the PyTorch module (eval mode)."""
    def ln(y, g, b):
        mu = jnp.mean(y, axis=-1, keepdims=True)
        var = jnp.mean(jnp.square(y - mu), axis=-1, keepdims=True)
        return (y - mu) / jnp.sqrt(var + LN_EPS) * g + b

    def gelu(y):
        if approx_gelu:
            c = jnp.sqrt(2.0 / jnp.pi)
            return 0.5 * y * (1.0 + jnp.tanh(c * (y + 0.044715 * y ** 3)))
        return 0.5 * y * (1.0 + lax.erf(y / jnp.sqrt(2.0)))

    y = x @ w1t
    y = gelu(ln(y, g1, b1))
    y = y @ w2t
    y = gelu(ln(y, g2, b2))
    return y @ w3t


if __name__ == "__main__":
    # Module config: MLPReadout(input_dim=128, output_dim=8, L=2)
    N, D_in, D_out = 16, 128, 8
    D1, D2 = D_in // 2, D_in // 4      # 64, 32

    key = jax.random.PRNGKey(0)
    kx, kx2, k1, k2, k3 = jax.random.split(key, 5)

    x = jax.random.normal(kx, (N, D_in), dtype=jnp.float32)

    # PyTorch Linear weight is [out, in]; we store it pre-transposed [in, out].
    def init_w(k, d_in, d_out):
        bound = 1.0 / jnp.sqrt(d_in)
        return jax.random.uniform(k, (d_in, d_out), jnp.float32, -bound, bound)

    w1t = init_w(k1, D_in, D1)
    w2t = init_w(k2, D1, D2)
    w3t = init_w(k3, D2, D_out)
    # nn.LayerNorm default init: weight = 1, bias = 0.
    g1 = jnp.ones((1, D1), jnp.float32)
    b1 = jnp.zeros((1, D1), jnp.float32)
    g2 = jnp.ones((1, D2), jnp.float32)
    b2 = jnp.zeros((1, D2), jnp.float32)

    # TODO(synk): dropout is identity here (inference mode); training-mode
    # stochastic dropout would use pltpu.prng_seed / pltpu.prng_random_bits.

    # 1) Exact-parity path: f32 + erf GELU, checked tightly vs the PyTorch-
    #    equivalent reference.
    out_exact = mlp_readout(x, w1t, g1, b1, w2t, g2, b2, w3t,
                            approx_gelu=False, compute_dtype=jnp.float32)
    jax.block_until_ready(out_exact)
    assert out_exact.shape == (N, D_out)
    ref = _reference(x, w1t, g1, b1, w2t, g2, b2, w3t, approx_gelu=False)
    assert jnp.allclose(out_exact, ref, atol=1e-4, rtol=1e-4), (
        float(jnp.max(jnp.abs(out_exact - ref))))

    # 2) Ragged-batch path (N not a multiple of the sublane tile): exercises
    #    the in-kernel tail masking + clamped output store (no wrapper pad).
    N2 = 20
    x2 = jax.random.normal(kx2, (N2, D_in), dtype=jnp.float32)
    out_ragged = mlp_readout(x2, w1t, g1, b1, w2t, g2, b2, w3t,
                             approx_gelu=False, compute_dtype=jnp.float32)
    jax.block_until_ready(out_ragged)
    assert out_ragged.shape == (N2, D_out)
    ref2 = _reference(x2, w1t, g1, b1, w2t, g2, b2, w3t, approx_gelu=False)
    assert jnp.allclose(out_ragged, ref2, atol=1e-4, rtol=1e-4), (
        float(jnp.max(jnp.abs(out_ragged - ref2))))

    # 3) Fast default path: bf16 I/O + tanh-approx GELU (perf configuration).
    out_fast = mlp_readout(x, w1t, g1, b1, w2t, g2, b2, w3t)
    jax.block_until_ready(out_fast)
    assert out_fast.shape == (N, D_out)
    assert out_fast.dtype == jnp.bfloat16
    ref_tanh = _reference(x, w1t, g1, b1, w2t, g2, b2, w3t, approx_gelu=True)
    assert jnp.allclose(out_fast.astype(jnp.float32), ref_tanh,
                        atol=5e-2, rtol=5e-2), (
        float(jnp.max(jnp.abs(out_fast.astype(jnp.float32) - ref_tanh))))

    print("KERNEL_OK")
</pallas_src>

<mosaic_0001>
module attributes {stable_mosaic.version = 11 : i64} {
  func.func @mlp_readout_kernel(%arg0: i32, %arg1: memref<16x128xf32, #tpu.memory_space<vmem>>, %arg2: memref<128x64xf32, #tpu.memory_space<vmem>>, %arg3: memref<1x64xf32, #tpu.memory_space<vmem>>, %arg4: memref<1x64xf32, #tpu.memory_space<vmem>>, %arg5: memref<64x32xf32, #tpu.memory_space<vmem>>, %arg6: memref<1x32xf32, #tpu.memory_space<vmem>>, %arg7: memref<1x32xf32, #tpu.memory_space<vmem>>, %arg8: memref<32x8xf32, #tpu.memory_space<vmem>>, %arg9: memref<16x8xf32, #tpu.memory_space<vmem>>) attributes {dimension_semantics = [#tpu.dimension_semantics<parallel>], iteration_bounds = array<i64: 1>, scalar_prefetch = 0 : i64, scratch_operands = 0 : i64, tpu.core_type = #tpu.core_type<tc>, window_params = [{transform_indices = @transform_0, window_bounds = array<i64: 16, 128>}, {pipeline_mode = #tpu.pipeline_mode<synchronous>, transform_indices = @transform_1, window_bounds = array<i64: 128, 64>}, {pipeline_mode = #tpu.pipeline_mode<synchronous>, transform_indices = @transform_2, window_bounds = array<i64: 1, 64>}, {pipeline_mode = #tpu.pipeline_mode<synchronous>, transform_indices = @transform_3, window_bounds = array<i64: 1, 64>}, {pipeline_mode = #tpu.pipeline_mode<synchronous>, transform_indices = @transform_4, window_bounds = array<i64: 64, 32>}, {pipeline_mode = #tpu.pipeline_mode<synchronous>, transform_indices = @transform_5, window_bounds = array<i64: 1, 32>}, {pipeline_mode = #tpu.pipeline_mode<synchronous>, transform_indices = @transform_6, window_bounds = array<i64: 1, 32>}, {pipeline_mode = #tpu.pipeline_mode<synchronous>, transform_indices = @transform_7, window_bounds = array<i64: 32, 8>}, {transform_indices = @transform_8, window_bounds = array<i64: 16, 8>}]} {
    %c0 = arith.constant 0 : index
    %c0_0 = arith.constant 0 : index
    %0 = vector.load %arg3[%c0, %c0_0] : memref<1x64xf32, #tpu.memory_space<vmem>>, vector<1x64xf32>
    %c0_1 = arith.constant 0 : index
    %c0_2 = arith.constant 0 : index
    %1 = vector.load %arg4[%c0_1, %c0_2] : memref<1x64xf32, #tpu.memory_space<vmem>>, vector<1x64xf32>
    %c0_3 = arith.constant 0 : index
    %c0_4 = arith.constant 0 : index
    %2 = vector.load %arg6[%c0_3, %c0_4] : memref<1x32xf32, #tpu.memory_space<vmem>>, vector<1x32xf32>
    %c0_5 = arith.constant 0 : index
    %c0_6 = arith.constant 0 : index
    %3 = vector.load %arg7[%c0_5, %c0_6] : memref<1x32xf32, #tpu.memory_space<vmem>>, vector<1x32xf32>
    %c0_7 = arith.constant 0 : index
    %c0_8 = arith.constant 0 : index
    %4 = vector.load %arg1[%c0_7, %c0_8] : memref<16x128xf32, #tpu.memory_space<vmem>>, vector<16x128xf32>
    %c0_9 = arith.constant 0 : index
    %c0_10 = arith.constant 0 : index
    %5 = vector.load %arg2[%c0_9, %c0_10] : memref<128x64xf32, #tpu.memory_space<vmem>>, vector<128x64xf32>
    %cst = arith.constant dense<0.000000e+00> : vector<16x64xf32>
    %6 = tpu.matmul %4, %5, %cst {dimension_numbers = #tpu.dot_dimension_numbers<[1], [0], [0], [1], [0, 0, 1, 1], [], []>} : vector<16x128xf32>, vector<128x64xf32>, vector<16x64xf32> -> vector<16x64xf32>
    %cst_11 = arith.constant dense<0.000000e+00> : vector<16xf32>
    %7 = vector.multi_reduction <add>, %6, %cst_11 [1] : vector<16x64xf32> to vector<16xf32>
    %8 = vector.shape_cast %7 : vector<16xf32> to vector<16x1xf32>
    %cst_12 = arith.constant 6.400000e+01 : f32
    %9 = vector.broadcast %cst_12 : f32 to vector<16x1xf32>
    %10 = arith.divf %8, %9 : vector<16x1xf32>
    %11 = vector.broadcast %10 : vector<16x1xf32> to vector<16x64xf32>
    %12 = arith.subf %6, %11 : vector<16x64xf32>
    %13 = arith.mulf %12, %12 : vector<16x64xf32>
    %cst_13 = arith.constant dense<0.000000e+00> : vector<16xf32>
    %14 = vector.multi_reduction <add>, %13, %cst_13 [1] : vector<16x64xf32> to vector<16xf32>
    %15 = vector.shape_cast %14 : vector<16xf32> to vector<16x1xf32>
    %cst_14 = arith.constant 6.400000e+01 : f32
    %16 = vector.broadcast %cst_14 : f32 to vector<16x1xf32>
    %17 = arith.divf %15, %16 : vector<16x1xf32>
    %cst_15 = arith.constant 9.99999974E-6 : f32
    %18 = vector.broadcast %cst_15 : f32 to vector<16x1xf32>
    %19 = arith.addf %17, %18 : vector<16x1xf32>
    %20 = math.rsqrt %19 : vector<16x1xf32>
    %21 = vector.broadcast %20 : vector<16x1xf32> to vector<16x64xf32>
    %22 = arith.mulf %12, %21 : vector<16x64xf32>
    %23 = vector.broadcast %0 : vector<1x64xf32> to vector<16x64xf32>
    %24 = arith.mulf %22, %23 : vector<16x64xf32>
    %25 = vector.broadcast %1 : vector<1x64xf32> to vector<16x64xf32>
    %26 = arith.addf %24, %25 : vector<16x64xf32>
    %cst_16 = arith.constant 5.000000e-01 : f32
    %27 = vector.broadcast %cst_16 : f32 to vector<16x64xf32>
    %28 = arith.mulf %27, %26 : vector<16x64xf32>
    %cst_17 = arith.constant 0.707106769 : f32
    %29 = vector.broadcast %cst_17 : f32 to vector<16x64xf32>
    %30 = arith.mulf %26, %29 : vector<16x64xf32>
    %31 = math.erf %30 : vector<16x64xf32>
    %cst_18 = arith.constant 1.000000e+00 : f32
    %32 = vector.broadcast %cst_18 : f32 to vector<16x64xf32>
    %33 = arith.addf %32, %31 : vector<16x64xf32>
    %34 = arith.mulf %28, %33 : vector<16x64xf32>
    %c0_19 = arith.constant 0 : index
    %c0_20 = arith.constant 0 : index
    %35 = vector.load %arg5[%c0_19, %c0_20] : memref<64x32xf32, #tpu.memory_space<vmem>>, vector<64x32xf32>
    %cst_21 = arith.constant dense<0.000000e+00> : vector<16x32xf32>
    %36 = tpu.matmul %34, %35, %cst_21 {dimension_numbers = #tpu.dot_dimension_numbers<[1], [0], [0], [1], [0, 0, 1, 1], [], []>} : vector<16x64xf32>, vector<64x32xf32>, vector<16x32xf32> -> vector<16x32xf32>
    %cst_22 = arith.constant dense<0.000000e+00> : vector<16xf32>
    %37 = vector.multi_reduction <add>, %36, %cst_22 [1] : vector<16x32xf32> to vector<16xf32>
    %38 = vector.shape_cast %37 : vector<16xf32> to vector<16x1xf32>
    %cst_23 = arith.constant 3.200000e+01 : f32
    %39 = vector.broadcast %cst_23 : f32 to vector<16x1xf32>
    %40 = arith.divf %38, %39 : vector<16x1xf32>
    %41 = vector.broadcast %40 : vector<16x1xf32> to vector<16x32xf32>
    %42 = arith.subf %36, %41 : vector<16x32xf32>
    %43 = arith.mulf %42, %42 : vector<16x32xf32>
    %cst_24 = arith.constant dense<0.000000e+00> : vector<16xf32>
    %44 = vector.multi_reduction <add>, %43, %cst_24 [1] : vector<16x32xf32> to vector<16xf32>
    %45 = vector.shape_cast %44 : vector<16xf32> to vector<16x1xf32>
    %cst_25 = arith.constant 3.200000e+01 : f32
    %46 = vector.broadcast %cst_25 : f32 to vector<16x1xf32>
    %47 = arith.divf %45, %46 : vector<16x1xf32>
    %cst_26 = arith.constant 9.99999974E-6 : f32
    %48 = vector.broadcast %cst_26 : f32 to vector<16x1xf32>
    %49 = arith.addf %47, %48 : vector<16x1xf32>
    %50 = math.rsqrt %49 : vector<16x1xf32>
    %51 = vector.broadcast %50 : vector<16x1xf32> to vector<16x32xf32>
    %52 = arith.mulf %42, %51 : vector<16x32xf32>
    %53 = vector.broadcast %2 : vector<1x32xf32> to vector<16x32xf32>
    %54 = arith.mulf %52, %53 : vector<16x32xf32>
    %55 = vector.broadcast %3 : vector<1x32xf32> to vector<16x32xf32>
    %56 = arith.addf %54, %55 : vector<16x32xf32>
    %cst_27 = arith.constant 5.000000e-01 : f32
    %57 = vector.broadcast %cst_27 : f32 to vector<16x32xf32>
    %58 = arith.mulf %57, %56 : vector<16x32xf32>
    %cst_28 = arith.constant 0.707106769 : f32
    %59 = vector.broadcast %cst_28 : f32 to vector<16x32xf32>
    %60 = arith.mulf %56, %59 : vector<16x32xf32>
    %61 = math.erf %60 : vector<16x32xf32>
    %cst_29 = arith.constant 1.000000e+00 : f32
    %62 = vector.broadcast %cst_29 : f32 to vector<16x32xf32>
    %63 = arith.addf %62, %61 : vector<16x32xf32>
    %64 = arith.mulf %58, %63 : vector<16x32xf32>
    %c0_30 = arith.constant 0 : index
    %c0_31 = arith.constant 0 : index
    %65 = vector.load %arg8[%c0_30, %c0_31] : memref<32x8xf32, #tpu.memory_space<vmem>>, vector<32x8xf32>
    %cst_32 = arith.constant dense<0.000000e+00> : vector<16x8xf32>
    %66 = tpu.matmul %64, %65, %cst_32 {dimension_numbers = #tpu.dot_dimension_numbers<[1], [0], [0], [1], [0, 0, 1, 1], [], []>} : vector<16x32xf32>, vector<32x8xf32>, vector<16x8xf32> -> vector<16x8xf32>
    %c0_33 = arith.constant 0 : index
    %c0_34 = arith.constant 0 : index
    %67 = vector.load %arg9[%c0_33, %c0_34] : memref<16x8xf32, #tpu.memory_space<vmem>>, vector<16x8xf32>
    tpu.vector_store %arg9[%c0_33, %c0_34], %66 {strides = array<i32>} : memref<16x8xf32, #tpu.memory_space<vmem>>, vector<16x8xf32>,
    return
  }
  func.func @transform_0(%arg0: i32) -> (i32, i32) {
    %c0_i32 = arith.constant 0 : i32
    %c0_i32_0 = arith.constant 0 : i32
    return %arg0, %c0_i32 : i32, i32
  }
  func.func @transform_1(%arg0: i32) -> (i32, i32) {
    %c0_i32 = arith.constant 0 : i32
    %c0_i32_0 = arith.constant 0 : i32
    %c0_i32_1 = arith.constant 0 : i32
    return %c0_i32, %c0_i32_0 : i32, i32
  }
  func.func @transform_2(%arg0: i32) -> (i32, i32) {
    %c0_i32 = arith.constant 0 : i32
    %c0_i32_0 = arith.constant 0 : i32
    %c0_i32_1 = arith.constant 0 : i32
    return %c0_i32, %c0_i32_0 : i32, i32
  }
  func.func @transform_3(%arg0: i32) -> (i32, i32) {
    %c0_i32 = arith.constant 0 : i32
    %c0_i32_0 = arith.constant 0 : i32
    %c0_i32_1 = arith.constant 0 : i32
    return %c0_i32, %c0_i32_0 : i32, i32
  }
  func.func @transform_4(%arg0: i32) -> (i32, i32) {
    %c0_i32 = arith.constant 0 : i32
    %c0_i32_0 = arith.constant 0 : i32
    %c0_i32_1 = arith.constant 0 : i32
    return %c0_i32, %c0_i32_0 : i32, i32
  }
  func.func @transform_5(%arg0: i32) -> (i32, i32) {
    %c0_i32 = arith.constant 0 : i32
    %c0_i32_0 = arith.constant 0 : i32
    %c0_i32_1 = arith.constant 0 : i32
    return %c0_i32, %c0_i32_0 : i32, i32
  }
  func.func @transform_6(%arg0: i32) -> (i32, i32) {
    %c0_i32 = arith.constant 0 : i32
    %c0_i32_0 = arith.constant 0 : i32
    %c0_i32_1 = arith.constant 0 : i32
    return %c0_i32, %c0_i32_0 : i32, i32
  }
  func.func @transform_7(%arg0: i32) -> (i32, i32) {
    %c0_i32 = arith.constant 0 : i32
    %c0_i32_0 = arith.constant 0 : i32
    %c0_i32_1 = arith.constant 0 : i32
    return %c0_i32, %c0_i32_0 : i32, i32
  }
  func.func @transform_8(%arg0: i32) -> (i32, i32) {
    %c0_i32 = arith.constant 0 : i32
    %c0_i32_0 = arith.constant 0 : i32
    return %arg0, %c0_i32 : i32, i32
  }
}

</mosaic_0001>

<bundles_post_ra>
// kernel: mlp_readout.1
= control target key start
LH: loop header
LB: loop body
LE: loop exit
PB: predicated region body
PF: predicated region fallthrough
CT: control target
= control target key end

     0   :  { %vm126_vm0 = vcmask 523264   ;;  %vm269_vm1 = vcmask 261120   ;;  %vm408_vm2 = vcmask 64512   ;;  %s759_s1 = inlined_call_operand.vmem [shape: f32[128,64], index: 1, kind: input, shape index: {}]   ;;  %s760_s0 = inlined_call_operand.vmem [shape: f32[16,128], index: 0, kind: input, shape index: {}]   ;;  %s761_s4 = inlined_call_operand.vmem [shape: f32[64,32], index: 4, kind: input, shape index: {}]   ;;  %s762_s2 = inlined_call_operand.vmem [shape: f32[1,64], index: 2, kind: input, shape index: {}]   ;;  %s763_s3 = inlined_call_operand.vmem [shape: f32[1,64], index: 3, kind: input, shape index: {}]   ;;  %s764_s7 = inlined_call_operand.vmem [shape: f32[32,8], index: 7, kind: input, shape index: {}]   ;;  %s765_s5 = inlined_call_operand.vmem [shape: f32[1,32], index: 5, kind: input, shape index: {}]   ;;  %s766_s6 = inlined_call_operand.vmem [shape: f32[1,32], index: 6, kind: input, shape index: {}]   ;;  %s767_s8 = inlined_call_operand.vmem [shape: f32[16,8], index: 8, kind: output, shape index: {}]  }
   0x1   :  { %v35_v0 = vld [vmem:[%s759_s1] sm:$0xff]  ;;  %v36_v1 = vld [vmem:[%s759_s1 + $0x8] sm:$0xff]  ;;  %v37_v2 = vld [vmem:[%s759_s1 + $0x10] sm:$0xff] }
   0x2   :  { %v522_v3 = vpack.c.bf16 %v36_v1, %v35_v0  ;;  %v38_v4 = vld [vmem:[%s759_s1 + $0x18] sm:$0xff]  ;;  %v39_v6 = vld [vmem:[%s759_s1 + $0x20] sm:$0xff]  ;;  %v40_v7 = vld [vmem:[%s759_s1 + $0x28] sm:$0xff] }
   0x3   :  { %v526_v5 = vpack.c.bf16 %v38_v4, %v37_v2  ;;  %v530_v8 = vpack.c.bf16 %v40_v7, %v39_v6  ;;  %v33_v9 = vld [vmem:[%s760_s0] sm:$0xff]  ;;  %v41_v10 = vld [vmem:[%s759_s1 + $0x30] sm:$0xff]  ;;  %v42_v11 = vld [vmem:[%s759_s1 + $0x38] sm:$0xff] }
   0x4   :  { %523 = vmatprep.subr.bf16.mxu0 %v522_v3  ;;  %489 = vmatprep.mubr.f32.mxu0 %v33_v9  ;;  %v534_v12 = vpack.c.bf16 %v42_v11, %v41_v10  ;;  %v43_v13 = vld [vmem:[%s759_s1 + $0x40] sm:$0xff]  ;;  %v44_v14 = vld [vmem:[%s759_s1 + $0x48] sm:$0xff]  ;;  %v45_v16 = vld [vmem:[%s759_s1 + $0x50] sm:$0xff] }
   0x5   :  { %525 = vmatpush3.bf16.msra.mxu0 %v522_v3  ;;  %v538_v15 = vpack.c.bf16 %v44_v14, %v43_v13  ;;  %v46_v17 = vld [vmem:[%s759_s1 + $0x58] sm:$0xff]  ;;  %v47_v19 = vld [vmem:[%s759_s1 + $0x60] sm:$0xff]  ;;  %v48_v20 = vld [vmem:[%s759_s1 + $0x68] sm:$0xff] }
   0x6   :  { %527 = vmatprep.subr.bf16.mxu0 %v526_v5  ;;  %v542_v18 = vpack.c.bf16 %v46_v17, %v45_v16  ;;  %v546_v21 = vpack.c.bf16 %v48_v20, %v47_v19  ;;  %v49_v22 = vld [vmem:[%s759_s1 + $0x70] sm:$0xff]  ;;  %v50_v23 = vld [vmem:[%s759_s1 + $0x78] sm:$0xff]  ;;  %v34_v25 = vld [vmem:[%s760_s0 + $0x8] sm:$0xff] }
   0x7   :  { %v550_v24 = vpack.c.bf16 %v50_v23, %v49_v22  ;;  %v180_v40 = vld [vmem:[%s761_s4] sm:$0xff]  ;;  %v181_v41 = vld [vmem:[%s761_s4 + $0x8] sm:$0xff]  ;;  %v182_v42 = vld [vmem:[%s761_s4 + $0x10] sm:$0xff] }
   0x8   :  { %v554_v43 = vpack.c.bf16 %v181_v41, %v180_v40  ;;  %v183_v44 = vld [vmem:[%s761_s4 + $0x18] sm:$0xff]  ;;  %v184_v46 = vld [vmem:[%s761_s4 + $0x20] sm:$0xff]  ;;  %v185_v47 = vld [vmem:[%s761_s4 + $0x28] sm:$0xff] }
   0x9   :  { %529 = vmatpush3.bf16.msra.mxu0 %v526_v5  ;;  %v558_v45 = vpack.c.bf16 %v183_v44, %v182_v42  ;;  %v562_v48 = vpack.c.bf16 %v185_v47, %v184_v46  ;;  %v186_v49 = vld [vmem:[%s761_s4 + $0x30] sm:$0xff]  ;;  %v187_v50 = vld [vmem:[%s761_s4 + $0x38] sm:$0xff]  ;;  %v415_v59 = vld [vmem:[%s762_s2] ss:$0 sm:$0xff] }
   0xa   :  { %531 = vmatprep.subr.bf16.mxu0 %v530_v8  ;;  %555 = vmatprep.subr.bf16.mxu1 %v554_v43  ;;  %v566_v51 = vpack.c.bf16 %v187_v50, %v186_v49  ;;  %v416_v61 = vld [vmem:[%s763_s3] ss:$0 sm:$0xff] }
   0xb   :  { %557 = vmatpush3.bf16.msra.mxu1 %v554_v43  ;;  %v419_v41 = vld [vmem:[%s765_s5] ss:$0 sm:$0xff] }
   0xc   :  { %559 = vmatprep.subr.bf16.mxu1 %v558_v45 }
   0xd   :  { %533 = vmatpush3.bf16.msra.mxu0 %v530_v8 }
   0xe   :  { %535 = vmatprep.subr.bf16.mxu0 %v534_v12 }
   0xf   :  { %561 = vmatpush3.bf16.msra.mxu1 %v558_v45  ;;  %v420_v45 = vld [vmem:[%s766_s6] ss:$0 sm:$0xff] }
  0x10   :  { %563 = vmatprep.subr.bf16.mxu1 %v562_v48 }
  0x11   :  { %537 = vmatpush3.bf16.msra.mxu0 %v534_v12 }
  0x12   :  { %539 = vmatprep.subr.bf16.mxu0 %v538_v15 }
  0x13   :  { %565 = vmatpush3.bf16.msra.mxu1 %v562_v48 }
  0x14   :  { %567 = vmatprep.subr.bf16.mxu1 %v566_v51 }
  0x15   :  { %541 = vmatpush3.bf16.msra.mxu0 %v538_v15 }
  0x16   :  { %543 = vmatprep.subr.bf16.mxu0 %v542_v18 }
  0x17   :  { %569 = vmatpush3.bf16.msra.mxu1 %v566_v51 }
  0x19   :  { %545 = vmatpush3.bf16.msra.mxu0 %v542_v18 }
  0x1a   :  { %547 = vmatprep.subr.bf16.mxu0 %v546_v21 }
  0x1d   :  { %549 = vmatpush3.bf16.msra.mxu0 %v546_v21 }
  0x1e   :  { %551 = vmatprep.subr.bf16.mxu0 %v550_v24 }
  0x21   :  { %553 = vmatpush3.bf16.msra.mxu0 %v550_v24 }
  0x24   :  { %490 = vmatmul.mubr.f32.vlgmr.msra.gmra.mrb[0].mxu0 %v34_v25 }
  0xf7   :  { %v491_v26 = vpop.f32.mrb[0].mxu0 }
  0xf8   :  { %v117_v27 = vpop.f32.mrb[1].mxu0  ;;  %v130_v29 = vsel %vm126_vm0, %v491_v26, 0.0 }
  0xf9   :  { %v127_v28 = vsel %vm126_vm0, %v117_v27, 0.0 }
  0xfa   :  { %128 = vadd.xlane.f32.xlu0 %v127_v28  ;;  %v323_v28 = vld [vmem:[%s764_s7] sm:$0xff] }
  0xfe   :  { %131 = vadd.xlane.f32.xlu0 %v130_v29  ;;  %v324_v29 = vld [vmem:[%s764_s7 + $0x8] sm:$0xff] }
 0x187   :  { %v129_v30 = vpop.xlane.xlu0 %128 }
 0x188   :  { %v134_v31 = vmul.f32 0.015625, %v129_v30  ;;  %v325_v30 = vld [vmem:[%s764_s7 + $0x10] sm:$0xff] }
 0x18a   :  { %v136_v32 = vsub.f32 %v117_v27, %v134_v31  ;;  %v570_v31 = vpack.c.bf16 %v324_v29, %v323_v28 }
 0x18b   :  { %v132_v33 = vpop.xlane.xlu0 %131 }
 0x18c   :  { %v135_v34 = vmul.f32 0.015625, %v132_v33  ;;  %v138_v35 = vmul.f32 %v136_v32, %v136_v32  ;;  %571 = vmatprep.subr.bf16.mxu1 %v570_v31 }
 0x18e   :  { %v137_v36 = vsub.f32 %v491_v26, %v135_v34  ;;  %v140_v37 = vsel %vm126_vm0, %v138_v35, 0.0 }
 0x18f   :  { %141 = vadd.xlane.f32.xlu1 %v140_v37 }
 0x190   :  { %v139_v38 = vmul.f32 %v137_v36, %v137_v36 }
 0x192   :  { %v143_v39 = vsel %vm126_vm0, %v139_v38, 0.0 }
 0x193   :  { %144 = vadd.xlane.f32.xlu1 %v143_v39 }
 0x21c   :  { %v142_v52 = vpop.xlane.xlu1 %141 }
 0x21d   :  { %v146_v53 = vmul.f32 0.015625, %v142_v52 }
 0x21f   :  { %v148_v54 = vadd.f32 1e-05, %v146_v53 }
 0x220   :  { %v145_v55 = vpop.xlane.xlu1 %144 }
 0x221   :  { %578 = vrsqrt.f32 %v148_v54  ;;  %v147_v56 = vmul.f32 0.015625, %v145_v55 }
 0x223   :  { %v149_v57 = vadd.f32 1e-05, %v147_v56 }
 0x225   :  { %580 = vrsqrt.f32 %v149_v57 }
 0x22b   :  { %v579_v58 = vpop.eup %578 }
 0x22c   :  { %v152_v60 = vmul.f32 %v579_v58, %v136_v32  ;;  %v326_v32 = vld [vmem:[%s764_s7 + $0x18] sm:$0xff] }
 0x22d   :  { %v574_v33 = vpack.c.bf16 %v326_v32, %v325_v30 }
 0x22e   :  { %v160_v62 = vmul.f32 %v415_v59, %v152_v60 }
 0x22f   :  { %v581_v63 = vpop.eup %580 }
 0x230   :  { %v153_v0 = vmul.f32 %v581_v63, %v137_v36  ;;  %v168_v1 = vadd.f32 %v416_v61, %v160_v62 }
 0x232   :  { %v161_v2 = vmul.f32 %v415_v59, %v153_v0  ;;  %v172_v3 = vmul.f32 0.70710677, %v168_v1  ;;  %v170_v7 = vmul.f32 0.5, %v168_v1 }
 0x234   :  { %v169_v4 = vadd.f32 %v416_v61, %v161_v2  ;;  %582 = verf.f32 %v172_v3 }
 0x236   :  { %v173_v5 = vmul.f32 0.70710677, %v169_v4  ;;  %v171_v11 = vmul.f32 0.5, %v169_v4 }
 0x238   :  { %584 = verf.f32 %v173_v5 }
 0x23e   :  { %v583_v6 = vpop.eup %582 }
 0x23f   :  { %v176_v8 = vadd.f32 1.0, %v583_v6 }
 0x241   :  { %v178_v9 = vmul.f32 %v176_v8, %v170_v7 }
 0x242   :  { %v585_v10 = vpop.eup %584 }
 0x243   :  { %508 = vmatprep.mubr.msk.f32.mxu1 %vm126_vm0, %v178_v9  ;;  %v177_v12 = vadd.f32 1.0, %v585_v10 }
 0x245   :  { %v179_v13 = vmul.f32 %v177_v12, %v171_v11 }
 0x247   :  { %509 = vmatmul.mubr.msk.f32.vlgmr.msra.gmra.mrb[0].mxu1 %vm126_vm0, %v179_v13 }
 0x248   :  { %573 = vmatpush3.bf16.msra.mxu1 %v570_v31 }
 0x249   :  { %575 = vmatprep.subr.bf16.mxu1 %v574_v33 }
 0x24c   :  { %577 = vmatpush3.bf16.msra.mxu1 %v574_v33 }
 0x31a   :  { %v510_v14 = vpop.f32.mrb[0].mxu1 }
 0x31b   :  { %v260_v15 = vpop.f32.mrb[1].mxu1  ;;  %v273_v16 = vsel %vm269_vm1, %v510_v14, 0.0 }
 0x31c   :  { %274 = vadd.xlane.f32.xlu1 %v273_v16  ;;  %v270_v17 = vsel %vm269_vm1, %v260_v15, 0.0 }
 0x31d   :  { %271 = vadd.xlane.f32.xlu0 %v270_v17 }
 0x3a9   :  { %v275_v18 = vpop.xlane.xlu1 %274 }
 0x3aa   :  { %v278_v19 = vmul.f32 0.03125, %v275_v18  ;;  %v272_v20 = vpop.xlane.xlu0 %271 }
 0x3ab   :  { %v277_v21 = vmul.f32 0.03125, %v272_v20 }
 0x3ac   :  { %v280_v22 = vsub.f32 %v510_v14, %v278_v19 }
 0x3ad   :  { %v279_v23 = vsub.f32 %v260_v15, %v277_v21 }
 0x3ae   :  { %v282_v24 = vmul.f32 %v280_v22, %v280_v22 }
 0x3af   :  { %v281_v25 = vmul.f32 %v279_v23, %v279_v23 }
 0x3b0   :  { %v286_v26 = vsel %vm269_vm1, %v282_v24, 0.0 }
 0x3b1   :  { %287 = vadd.xlane.f32.xlu1 %v286_v26  ;;  %v283_v27 = vsel %vm269_vm1, %v281_v25, 0.0 }
 0x3b2   :  { %284 = vadd.xlane.f32.xlu0 %v283_v27 }
 0x43e   :  { %v288_v34 = vpop.xlane.xlu1 %287 }
 0x43f   :  { %v290_v35 = vmul.f32 0.03125, %v288_v34  ;;  %v285_v36 = vpop.xlane.xlu0 %284 }
 0x440   :  { %v289_v37 = vmul.f32 0.03125, %v285_v36 }
 0x441   :  { %v292_v38 = vadd.f32 1e-05, %v290_v35 }
 0x442   :  { %v291_v39 = vadd.f32 1e-05, %v289_v37 }
 0x443   :  { %586 = vrsqrt.f32 %v292_v38 }
 0x444   :  { %588 = vrsqrt.f32 %v291_v39 }
 0x44d   :  { %v587_v40 = vpop.eup %586 }
 0x44e   :  { %v589_v42 = vpop.eup %588  ;;  %v296_v43 = vmul.f32 %v587_v40, %v280_v22 }
 0x44f   :  { %v295_v44 = vmul.f32 %v589_v42, %v279_v23 }
 0x450   :  { %v304_v46 = vmul.f32 %v419_v41, %v296_v43 }
 0x451   :  { %v303_v47 = vmul.f32 %v419_v41, %v295_v44 }
 0x452   :  { %v312_v48 = vadd.f32 %v420_v45, %v304_v46 }
 0x453   :  { %v311_v49 = vadd.f32 %v420_v45, %v303_v47 }
 0x454   :  { %v316_v50 = vmul.f32 0.70710677, %v312_v48  ;;  %v314_v57 = vmul.f32 0.5, %v312_v48 }
 0x455   :  { %v315_v51 = vmul.f32 0.70710677, %v311_v49  ;;  %v313_v55 = vmul.f32 0.5, %v311_v49 }
 0x456   :  { %590 = verf.f32 %v316_v50 }
 0x457   :  { %592 = verf.f32 %v315_v51 }
 0x460   :  { %v591_v52 = vpop.eup %590 }
 0x461   :  { %v593_v53 = vpop.eup %592  ;;  %v320_v54 = vadd.f32 1.0, %v591_v52 }
 0x462   :  { %v319_v56 = vadd.f32 1.0, %v593_v53 }
 0x463   :  { %v322_v59 = vmul.f32 %v320_v54, %v314_v57 }
 0x464   :  { %v321_v58 = vmul.f32 %v319_v56, %v313_v55 }
 0x466   :  { %519 = vmatprep.mubr.msk.f32.mxu1 %vm269_vm1, %v321_v58 }
 0x467   :  { %520 = vmatmul.mubr.msk.f32.vlgmr.msra.gmra.mrb[2].mxu1 %vm269_vm1, %v322_v59 }
 0x53a   :  { %v521_v60 = vpop.f32.mrb[2].mxu1 }
 0x53b   :  { %410 = vst.msk [vmem:[%s767_s8 + $0x8] sm:$0xff] %vm408_vm2, %v521_v60  ;;  %v399_v61 = vpop.f32.mrb[3].mxu1 }
 0x53c   :  { %409 = vst.msk [vmem:[%s767_s8] sm:$0xff] %vm408_vm2, %v399_v61 }

</bundles_post_ra>
